<compile_context>
chip_gen: v5e
topology: v5e:2x2
jax: 0.10.0
libtpu: 0.0.40
codegen_flags: <defaults>
</compile_context>

<pallas_src>
import jax
import jax.numpy as jnp
from jax.experimental import pallas as pl
from jax.experimental.pallas import tpu as pltpu

C_OUT = 256  # fixed by the module: Conv2d(1, 256, 1, stride=1, padding=1)


def _conv_sum_relu_kernel(c_ref, x_ref, out_ref):
    # c_ref:   (2,)   SMEM f32  -> [ sum(conv_w),  (H+2)*(W+2) * sum(conv_b) ]
    # x_ref:   (H, W) VMEM f32  -> raw input image (full-array block, no pre-padding)
    # out_ref: (1, 1) VMEM f32
    sx = jnp.sum(x_ref[...], keepdims=True)                      # (1, 1) sum of input pixels
    out_ref[...] = jnp.maximum(c_ref[0] * sx + c_ref[1], 0.0)    # relu(sum(w)*sum(x) + area*sum(b))


@jax.jit
def model_forward(x_nchw, conv_w, conv_b):
    """x_nchw: (1,1,H,W) f32; conv_w: (256,1,1,1); conv_b: (256,). Returns (1,1,1,1)."""
    n, c_in, h, w = x_nchw.shape
    # Algebraic collapse only valid under these module-implied constraints.
    assert n == 1 and c_in == 1
    padded_area = float((h + 2) * (w + 2))                       # Conv2d padding=1 on both sides

    x2d = x_nchw.reshape(h, w).astype(jnp.float32)               # metadata-only reshape
    consts = jnp.stack(
        [jnp.sum(conv_w), padded_area * jnp.sum(conv_b)]
    ).astype(jnp.float32)                                        # (2,) — fused by XLA, one tiny DMA

    out = pl.pallas_call(
        _conv_sum_relu_kernel,
        out_shape=jax.ShapeDtypeStruct((1, 1), jnp.float32),
        in_specs=[
            pl.BlockSpec(memory_space=pltpu.MemorySpace.SMEM),   # (2,) precomputed scalars
            pl.BlockSpec(memory_space=pltpu.MemorySpace.VMEM),   # full (H, W) image
        ],
        out_specs=pl.BlockSpec(memory_space=pltpu.MemorySpace.VMEM),
        cost_estimate=pl.CostEstimate(
            flops=2 * h * w + 4,
            transcendentals=0,
            bytes_accessed=4 * h * w + 12,
        ),
    )(consts, x2d)
    return out.reshape(1, 1, 1, 1)


def reference_forward(x_nchw, conv_w, conv_b):
    """Pure-JAX reference mirroring the PyTorch module exactly."""
    x_pad = jnp.pad(x_nchw[0, 0], ((1, 1), (1, 1)))                              # (H+2, W+2)
    v1 = conv_w.reshape(C_OUT, 1, 1) * x_pad[None, :, :] + conv_b.reshape(C_OUT, 1, 1)
    v2 = jnp.sum(v1)                                                             # ones-weight conv, N=1
    return jnp.maximum(v2, 0.0).reshape(1, 1, 1, 1)


if __name__ == "__main__":
    key = jax.random.PRNGKey(0)
    kx, kw, kb = jax.random.split(key, 3)
    # Input matching the module: (1, 1, 28, 28)
    x1 = jax.random.normal(kx, (1, 1, 28, 28), dtype=jnp.float32)
    # Conv2d(1, 256, 1) params; PyTorch default init is U(-1/sqrt(fan_in), 1/sqrt(fan_in)), fan_in=1
    conv_w = jax.random.uniform(kw, (C_OUT, 1, 1, 1), minval=-1.0, maxval=1.0, dtype=jnp.float32)
    conv_b = jax.random.uniform(kb, (C_OUT,), minval=-1.0, maxval=1.0, dtype=jnp.float32)

    out = model_forward(x1, conv_w, conv_b)
    jax.block_until_ready(out)

    ref = reference_forward(x1, conv_w, conv_b)
    assert out.shape == (1, 1, 1, 1)
    # Summation order differs from the faithful reference (fp32 non-associativity over ~230K terms);
    # result magnitude is O(1e3), so a loose absolute tolerance is appropriate.
    assert jnp.allclose(out, ref, rtol=1e-3, atol=0.5), (out, ref)
    print("KERNEL_OK")
</pallas_src>

<mosaic_0001>
module attributes {stable_mosaic.version = 11 : i64} {
  func.func @_conv_sum_relu_kernel(%arg0: memref<2xf32, #tpu.memory_space<smem>>, %arg1: memref<28x28xf32, #tpu.memory_space<vmem>>, %arg2: memref<1x1xf32, #tpu.memory_space<vmem>>) attributes {dimension_semantics = [], scalar_prefetch = 0 : i64, scratch_operands = 0 : i64, tpu.core_type = #tpu.core_type<tc>} {
    %c0 = arith.constant 0 : index
    %c0_0 = arith.constant 0 : index
    %0 = vector.load %arg1[%c0, %c0_0] : memref<28x28xf32, #tpu.memory_space<vmem>>, vector<28x28xf32>
    %1 = vector.shape_cast %0 : vector<28x28xf32> to vector<1x28x28xf32>
    %cst = arith.constant dense<0.000000e+00> : vector<1xf32>
    %2 = vector.multi_reduction <add>, %1, %cst [1, 2] : vector<1x28x28xf32> to vector<1xf32>
    %3 = vector.shape_cast %2 : vector<1xf32> to vector<1x1x1xf32>
    %4 = vector.extract %3[0, 0, 0] : f32 from vector<1x1x1xf32>
    %5 = vector.broadcast %4 : f32 to vector<1x1xf32>
    %c0_1 = arith.constant 0 : index
    %6 = memref.load %arg0[%c0_1] : memref<2xf32, #tpu.memory_space<smem>>
    %7 = vector.broadcast %6 : f32 to vector<1x1xf32>
    %8 = arith.mulf %7, %5 : vector<1x1xf32>
    %c1 = arith.constant 1 : index
    %9 = memref.load %arg0[%c1] : memref<2xf32, #tpu.memory_space<smem>>
    %10 = vector.broadcast %9 : f32 to vector<1x1xf32>
    %11 = arith.addf %8, %10 : vector<1x1xf32>
    %cst_2 = arith.constant 0.000000e+00 : f32
    %12 = vector.broadcast %cst_2 : f32 to vector<1x1xf32>
    %13 = arith.maximumf %11, %12 : vector<1x1xf32>
    %c0_3 = arith.constant 0 : index
    %c0_4 = arith.constant 0 : index
    %14 = vector.load %arg2[%c0_3, %c0_4] : memref<1x1xf32, #tpu.memory_space<vmem>>, vector<1x1xf32>
    tpu.vector_store %arg2[%c0_3, %c0_4], %13 {strides = array<i32>} : memref<1x1xf32, #tpu.memory_space<vmem>>, vector<1x1xf32>,
    return
  }
}

</mosaic_0001>

<bundles_post_ra>
// kernel: model_forward.1
= control target key start
LH: loop header
LB: loop body
LE: loop exit
PB: predicated region body
PF: predicated region fallthrough
CT: control target
= control target key end

     0   :  { %7 = vsyncpa [#allocation4], 0  ;;  %s154_s0 = inlined_call_operand.vmem [shape: f32[2], index: 0, kind: input, shape index: {}]   ;;  %s155_s1 = inlined_call_operand.vmem [shape: f32[28,28], index: 1, kind: input, shape index: {}]   ;;  %s156_s2 = inlined_call_operand.hbm [shape: f32[1,1], index: 2, kind: output, shape index: {}]  }
   0x1   :  { %8 = vsyncpa [#allocation3], 0  ;;  %s14_s11 = sshll.u32 %s154_s0, 4  ;;  %s119_s12 = smov [#allocation2]   ;;  %s15_s11 = int_to_ptr.vmem [resolvable:$true] %s14_s11 }
   0x2   :  { %17 = dma.vmem_to_smem %s15_s11, 16, %s119_s12, [#allocation4]  }
   0x3   :  { %115 = dma.done.wait [#allocation4], 16  }
   0x4   :  { %116 = vsyncadd [#allocation4], 4294967280 }
   0x5   :  { %24 = sfence }
   0x6   :  { %v25_v0 = vld [vmem:[%s155_s1] sm:$0xff]  ;;  %v26_v1 = vld [vmem:[%s155_s1 + $0x8] sm:$0xff]  ;;  %v27_v2 = vld [vmem:[%s155_s1 + $0x10] sm:$0xff]  ;;  %vm29_vm0 = vcmask 228352   ;;  %vm35_vm1 = vcmask 224256   ;;  %s48_s20 = sld [smem:[#allocation2]] }
   0x7   :  { %v28_v3 = vld [vmem:[%s155_s1 + $0x18] sm:$0xf]  ;;  %v30_v4 = vsel %vm29_vm0, %v25_v0, 0.0  ;;  %v31_v5 = vsel %vm29_vm0, %v26_v1, 0.0  ;;  %v33_v6 = vsel %vm29_vm0, %v27_v2, 0.0  ;;  %s74_s21 = sld [smem:[#allocation2 + $0x1]] }
   0x8   :  { %v32_v7 = vadd.f32 %v31_v5, %v30_v4  ;;  %v36_v8 = vsel %vm35_vm1, %v28_v3, 0.0  ;;  %s120_s22 = smov [#allocation5]   ;;  %s64_s26 = sshll.u32 %s156_s2, 4  ;;  %vm55_vm2 = vcmask 0   ;;  %s65_s26 = int_to_ptr.hbm [resolvable:$true] %s64_s26 }
   0x9   :  { %s62_s23 = sshll.u32 %s120_s22, 4  ;;  %s63_s23 = int_to_ptr.vmem [resolvable:$true] %s62_s23 }
   0xa   :  { %v34_v9 = vadd.f32 %v33_v6, %v32_v7 }
   0xc   :  { %v37_v10 = vadd.f32 %v36_v8, %v34_v9  ;;  %v49_v18 = vstv %s48_s20 }
   0xd   :  { %v52_v20 = vstv %s74_s21 }
   0xe   :  { %38 = vadd.xlane.f32.xlu0 %v37_v10 }
  0x81   :  { %v39_v11 = vpop.xlane.xlu0 %38 }
  0x82   :  { %v40_v12 = vrot.slane %v39_v11, 4 }
  0x84   :  { %v41_v13 = vadd.f32 %v40_v12, %v39_v11 }
  0x86   :  { %v42_v14 = vrot.slane %v41_v13, 2 }
  0x88   :  { %v43_v15 = vadd.f32 %v42_v14, %v41_v13 }
  0x8a   :  { %v44_v16 = vrot.slane %v43_v15, 1 }
  0x8c   :  { %v45_v17 = vadd.f32 %v44_v16, %v43_v15 }
  0x8e   :  { %75 = vpush %v45_v17 }
  0xbf   :  { %s76_s1 = spop %75 }
  0xc0   :  { %v47_v19 = vstv %s76_s1 }
  0xc1   :  { %v50_v21 = vmul.f32 %v49_v18, %v47_v19 }
  0xc3   :  { %v53_v22 = vadd.f32 %v52_v20, %v50_v21 }
  0xc5   :  { %v54_v23 = vmax.f32 %v53_v22, 0.0 }
  0xc7   :  { %56 = vst.msk [vmem:[#allocation5] sm:$0x1] %vm55_vm2, %v54_v23 }
  0xc8   :  { %67 = dma.vmem_to_hbm [thread:$0]  %s63_s23, 16, %s65_s26, [#allocation3]  }
  0xc9   :  { %117 = dma.done.wait [#allocation3], 16  }
  0xca   :  { %118 = vsyncadd [#allocation3], 4294967280 }
  0xcb   :  { %72 = vsyncpa [#allocation3], 1 }
  0xcc   :  { %73 = vsyncpa [#allocation4], 1 }

</bundles_post_ra>
